<compile_context>
chip_gen: v5e
topology: v5e:2x2
jax: 0.10.0
libtpu: 0.0.40
codegen_flags: <defaults>
</compile_context>

<pallas_src>
import functools

import jax
import jax.numpy as jnp
from jax.experimental import pallas as pl
from jax.experimental.pallas import tpu as pltpu


def _rmsnorm_kernel(x_ref, scale_ref, o_ref, *, eps: float, dim: int,
                    groups: int, bit_exact: bool):
    # x_ref: (tile_rows, groups*dim), scale_ref: (1, groups*dim),
    # o_ref: (tile_rows, groups*dim).  Each group of `dim` contiguous lanes is
    # one logical row and is normalized independently.
    x = x_ref[...]
    x32 = x.astype(jnp.float32)                                   # x.float()
    if groups == 1:
        ms = jnp.mean(x32 * x32, axis=-1, keepdims=True)          # mean(x^2,-1)
        normed = x32 * jax.lax.rsqrt(ms + eps)                    # rsqrt on EUP
    else:
        # Lane-folded path (dim < 128): static lane slices + per-segment
        # reduction keep everything on exact f32 VPU adds (no MXU rounding).
        parts = []
        for g in range(groups):
            seg = x32[:, g * dim:(g + 1) * dim]
            ms = jnp.mean(seg * seg, axis=-1, keepdims=True)
            parts.append(seg * jax.lax.rsqrt(ms + eps))
        normed = jnp.concatenate(parts, axis=-1)
    if bit_exact:
        # Bit-exact PyTorch parity: self._norm(x.float()).type_as(x) * scale.
        normed = normed.astype(x.dtype).astype(jnp.float32)
    out = normed * scale_ref[...].astype(jnp.float32)
    o_ref[...] = out.astype(o_ref.dtype)


def _vmem_capacity_bytes() -> int:
    """Per-core VMEM capacity; conservative fallback if the query fails."""
    try:
        info = pltpu.get_tpu_info()
        cap = getattr(info, "vmem_capacity_bytes", None)
        if cap:
            return int(cap)
    except Exception:  # pragma: no cover - CPU / old runtime fallback
        pass
    return 64 * 1024 * 1024  # v7x per-TC (smallest of v5e/v6e/v7x)


def _auto_tile_rows(rows: int, dim_eff: int, in_bytes: int, out_bytes: int,
                    vmem_budget_bytes: int, target_step_bytes: int,
                    min_grid_steps: int = 4) -> int:
    """Largest row tile that (a) fits the VMEM budget including f32 compute
    intermediates, (b) moves <= target_step_bytes of HBM traffic per grid
    step, and (c) leaves >= min_grid_steps steps (>= 2 per v7x TensorCore)."""
    # Sublane packing of the row axis: f32 -> 8 rows/vreg, bf16 -> 16, i8 -> 32.
    row_mult = max(8, 32 // max(1, in_bytes))
    hbm_per_row = dim_eff * (in_bytes + out_bytes)
    # Double-buffered in + out blocks, plus the f32 intermediates (x32 and the
    # scaled-output temporary) that live alongside one block.
    vmem_per_row = 2 * hbm_per_row + 2 * dim_eff * 4
    t = min(vmem_budget_bytes // max(1, vmem_per_row),
            max(1, target_step_bytes // max(1, hbm_per_row)))
    rows_rounded = -(-rows // row_mult) * row_mult
    per_step_cap = rows_rounded // min_grid_steps
    if per_step_cap >= row_mult:
        t = min(t, per_step_cap)
    t = max(row_mult, (t // row_mult) * row_mult)
    return min(t, rows_rounded)


def rmsnorm(x: jax.Array, scale: jax.Array, eps: float = 1e-6, *,
            tile_rows: int | None = None,
            out_dtype=None,
            bit_exact: bool = False,
            target_step_bytes: int = 32 * 1024 * 1024) -> jax.Array:
    """RMSNorm over the last axis of x, matching the PyTorch module's forward.

    out_dtype defaults to x.dtype (halves writeback traffic for bf16 inputs);
    pass jnp.float32 (and bit_exact=True) for strict PyTorch type-promotion
    parity. tile_rows, if given, must be a multiple of 8.
    """
    orig_shape = x.shape
    dim = orig_shape[-1]
    assert scale.shape == (dim,), (scale.shape, dim)

    if out_dtype is None:
        out_dtype = x.dtype

    x2d = x.reshape(-1, dim)
    rows = x2d.shape[0]

    # Lane-dense fold for small dims: pack `groups` consecutive logical rows
    # into one 128-lane physical row. Contiguous row-major data -> the reshape
    # is a free view (no HBM copy). Halve groups until it divides rows.
    groups = 1
    if dim < 128 and 128 % dim == 0:
        groups = 128 // dim
        while groups > 1 and rows % groups != 0:
            groups //= 2
    dim_eff = groups * dim
    rows_eff = rows // groups

    if groups > 1:
        x2d = x2d.reshape(rows_eff, dim_eff)
        scale_row = jnp.tile(scale, groups).reshape(1, dim_eff)
    else:
        scale_row = scale.reshape(1, dim)

    in_bytes = jnp.dtype(x.dtype).itemsize
    out_bytes = jnp.dtype(out_dtype).itemsize

    vmem_cap = _vmem_capacity_bytes()
    vmem_budget = vmem_cap // 2
    vmem_limit = min((3 * vmem_cap) // 4, 128 * 1024 * 1024)

    if tile_rows is None:
        tile_rows = _auto_tile_rows(rows_eff, dim_eff, in_bytes, out_bytes,
                                    vmem_budget, target_step_bytes)
    else:
        assert tile_rows % 8 == 0, "tile_rows must be a multiple of 8"

    grid = (pl.cdiv(rows_eff, tile_rows),)
    kernel = functools.partial(_rmsnorm_kernel, eps=eps, dim=dim,
                               groups=groups, bit_exact=bit_exact)

    cost = pl.CostEstimate(
        flops=4 * rows * dim,                       # square, accum, inv-mul, scale-mul
        transcendentals=rows,                       # one rsqrt per logical row
        bytes_accessed=rows * dim * (in_bytes + out_bytes)
        + dim_eff * jnp.dtype(scale.dtype).itemsize,
    )

    out = pl.pallas_call(
        kernel,
        out_shape=jax.ShapeDtypeStruct((rows_eff, dim_eff), out_dtype),
        grid_spec=pltpu.PrefetchScalarGridSpec(
            num_scalar_prefetch=0,
            grid=grid,
            in_specs=[
                pl.BlockSpec((tile_rows, dim_eff), lambda i: (i, 0)),
                # Constant block index -> stays resident in VMEM, no per-step DMA.
                pl.BlockSpec((1, dim_eff), lambda i: (0, 0)),
            ],
            out_specs=pl.BlockSpec((tile_rows, dim_eff), lambda i: (i, 0)),
        ),
        compiler_params=pltpu.CompilerParams(
            dimension_semantics=("parallel",),
            vmem_limit_bytes=vmem_limit,
        ),
        cost_estimate=cost,
    )(x2d, scale_row)

    return out.reshape(orig_shape)


def rmsnorm_reference(x, scale, eps=1e-6):
    x32 = x.astype(jnp.float32)
    normed = x32 * jax.lax.rsqrt(
        jnp.mean(x32 * x32, axis=-1, keepdims=True) + eps)
    return (normed * scale.astype(jnp.float32)).astype(x.dtype)


if __name__ == "__main__":
    key = jax.random.PRNGKey(0)
    k1, k2, k3 = jax.random.split(key, 3)

    dim = 32
    # Module init: scale = ones(dim).
    scale = jnp.ones((dim,), dtype=jnp.float32)

    # 1) small dim -> lane-dense folded path (groups = 128 // 32 = 4).
    x1 = jax.random.normal(k1, (2, 8, dim), dtype=jnp.float32)
    o1 = jax.block_until_ready(rmsnorm(x1, scale, eps=1e-6))
    r1 = rmsnorm_reference(x1, scale, eps=1e-6)
    assert o1.shape == r1.shape, (o1.shape, r1.shape)
    assert jnp.allclose(o1, r1, atol=1e-5, rtol=1e-5), "folded path mismatch"

    # 2) ragged row count -> reduced fold (groups=2) + masked tail block.
    x2 = jax.random.normal(k2, (2, 7, dim), dtype=jnp.float32)
    o2 = jax.block_until_ready(rmsnorm(x2, scale, eps=1e-6))
    r2 = rmsnorm_reference(x2, scale, eps=1e-6)
    assert o2.shape == r2.shape, (o2.shape, r2.shape)
    assert jnp.allclose(o2, r2, atol=1e-5, rtol=1e-5), "ragged path mismatch"

    # 3) dim >= 128 -> plain lane-dense path (no fold), non-trivial scale.
    dim3 = 256
    scale3 = 1.0 + 0.1 * jax.random.normal(k3, (dim3,), dtype=jnp.float32)
    x3 = jax.random.normal(k3, (2, 8, dim3), dtype=jnp.float32)
    o3 = jax.block_until_ready(rmsnorm(x3, scale3, eps=1e-6))
    r3 = rmsnorm_reference(x3, scale3, eps=1e-6)
    assert jnp.allclose(o3, r3, atol=1e-5, rtol=1e-5), "wide path mismatch"

    # 4) bf16 activations: out dtype defaults to bf16 (halved writeback bytes).
    x4 = x1.astype(jnp.bfloat16)
    o4 = jax.block_until_ready(rmsnorm(x4, scale, eps=1e-6))
    assert o4.dtype == jnp.bfloat16, o4.dtype
    r4 = rmsnorm_reference(x4.astype(jnp.float32), scale, eps=1e-6)
    assert jnp.allclose(o4.astype(jnp.float32), r4, atol=2e-2, rtol=2e-2), \
        "bf16 path mismatch"

    print("KERNEL_OK")
</pallas_src>

<mosaic_0001>
module attributes {stable_mosaic.version = 11 : i64} {
  func.func @_rmsnorm_kernel(%arg0: i32, %arg1: memref<8x128xf32, #tpu.memory_space<vmem>>, %arg2: memref<1x128xf32, #tpu.memory_space<vmem>>, %arg3: memref<8x128xf32, #tpu.memory_space<vmem>>) attributes {dimension_semantics = [#tpu.dimension_semantics<parallel>], iteration_bounds = array<i64: 1>, scalar_prefetch = 0 : i64, scratch_operands = 0 : i64, tpu.core_type = #tpu.core_type<tc>, window_params = [{transform_indices = @transform_0, window_bounds = array<i64: 8, 128>}, {pipeline_mode = #tpu.pipeline_mode<synchronous>, transform_indices = @transform_1, window_bounds = array<i64: 1, 128>}, {transform_indices = @transform_2, window_bounds = array<i64: 8, 128>}]} {
    %c0 = arith.constant 0 : index
    %c0_0 = arith.constant 0 : index
    %0 = vector.load %arg1[%c0, %c0_0] : memref<8x128xf32, #tpu.memory_space<vmem>>, vector<8x128xf32>
    %1 = vector.extract_strided_slice %0 {offsets = [0, 0], sizes = [8, 32], strides = [1, 1]} : vector<8x128xf32> to vector<8x32xf32>
    %2 = arith.mulf %1, %1 : vector<8x32xf32>
    %cst = arith.constant dense<0.000000e+00> : vector<8xf32>
    %3 = vector.multi_reduction <add>, %2, %cst [1] : vector<8x32xf32> to vector<8xf32>
    %4 = vector.shape_cast %3 : vector<8xf32> to vector<8x1xf32>
    %cst_1 = arith.constant 3.200000e+01 : f32
    %5 = vector.broadcast %cst_1 : f32 to vector<8x1xf32>
    %6 = arith.divf %4, %5 : vector<8x1xf32>
    %cst_2 = arith.constant 9.99999997E-7 : f32
    %7 = vector.broadcast %cst_2 : f32 to vector<8x1xf32>
    %8 = arith.addf %6, %7 : vector<8x1xf32>
    %9 = math.rsqrt %8 : vector<8x1xf32>
    %10 = vector.broadcast %9 : vector<8x1xf32> to vector<8x32xf32>
    %11 = arith.mulf %1, %10 : vector<8x32xf32>
    %12 = vector.extract_strided_slice %0 {offsets = [0, 32], sizes = [8, 32], strides = [1, 1]} : vector<8x128xf32> to vector<8x32xf32>
    %13 = arith.mulf %12, %12 : vector<8x32xf32>
    %cst_3 = arith.constant dense<0.000000e+00> : vector<8xf32>
    %14 = vector.multi_reduction <add>, %13, %cst_3 [1] : vector<8x32xf32> to vector<8xf32>
    %15 = vector.shape_cast %14 : vector<8xf32> to vector<8x1xf32>
    %cst_4 = arith.constant 3.200000e+01 : f32
    %16 = vector.broadcast %cst_4 : f32 to vector<8x1xf32>
    %17 = arith.divf %15, %16 : vector<8x1xf32>
    %cst_5 = arith.constant 9.99999997E-7 : f32
    %18 = vector.broadcast %cst_5 : f32 to vector<8x1xf32>
    %19 = arith.addf %17, %18 : vector<8x1xf32>
    %20 = math.rsqrt %19 : vector<8x1xf32>
    %21 = vector.broadcast %20 : vector<8x1xf32> to vector<8x32xf32>
    %22 = arith.mulf %12, %21 : vector<8x32xf32>
    %23 = vector.extract_strided_slice %0 {offsets = [0, 64], sizes = [8, 32], strides = [1, 1]} : vector<8x128xf32> to vector<8x32xf32>
    %24 = arith.mulf %23, %23 : vector<8x32xf32>
    %cst_6 = arith.constant dense<0.000000e+00> : vector<8xf32>
    %25 = vector.multi_reduction <add>, %24, %cst_6 [1] : vector<8x32xf32> to vector<8xf32>
    %26 = vector.shape_cast %25 : vector<8xf32> to vector<8x1xf32>
    %cst_7 = arith.constant 3.200000e+01 : f32
    %27 = vector.broadcast %cst_7 : f32 to vector<8x1xf32>
    %28 = arith.divf %26, %27 : vector<8x1xf32>
    %cst_8 = arith.constant 9.99999997E-7 : f32
    %29 = vector.broadcast %cst_8 : f32 to vector<8x1xf32>
    %30 = arith.addf %28, %29 : vector<8x1xf32>
    %31 = math.rsqrt %30 : vector<8x1xf32>
    %32 = vector.broadcast %31 : vector<8x1xf32> to vector<8x32xf32>
    %33 = arith.mulf %23, %32 : vector<8x32xf32>
    %34 = vector.extract_strided_slice %0 {offsets = [0, 96], sizes = [8, 32], strides = [1, 1]} : vector<8x128xf32> to vector<8x32xf32>
    %35 = arith.mulf %34, %34 : vector<8x32xf32>
    %cst_9 = arith.constant dense<0.000000e+00> : vector<8xf32>
    %36 = vector.multi_reduction <add>, %35, %cst_9 [1] : vector<8x32xf32> to vector<8xf32>
    %37 = vector.shape_cast %36 : vector<8xf32> to vector<8x1xf32>
    %cst_10 = arith.constant 3.200000e+01 : f32
    %38 = vector.broadcast %cst_10 : f32 to vector<8x1xf32>
    %39 = arith.divf %37, %38 : vector<8x1xf32>
    %cst_11 = arith.constant 9.99999997E-7 : f32
    %40 = vector.broadcast %cst_11 : f32 to vector<8x1xf32>
    %41 = arith.addf %39, %40 : vector<8x1xf32>
    %42 = math.rsqrt %41 : vector<8x1xf32>
    %43 = vector.broadcast %42 : vector<8x1xf32> to vector<8x32xf32>
    %44 = arith.mulf %34, %43 : vector<8x32xf32>
    %45 = tpu.concatenate %11, %22, %33, %44 in 1 : vector<8x32xf32>, vector<8x32xf32>, vector<8x32xf32>, vector<8x32xf32> -> vector<8x128xf32>
    %c0_12 = arith.constant 0 : index
    %c0_13 = arith.constant 0 : index
    %46 = vector.load %arg2[%c0_12, %c0_13] : memref<1x128xf32, #tpu.memory_space<vmem>>, vector<1x128xf32>
    %47 = vector.broadcast %46 : vector<1x128xf32> to vector<8x128xf32>
    %48 = arith.mulf %45, %47 : vector<8x128xf32>
    %c0_14 = arith.constant 0 : index
    %c0_15 = arith.constant 0 : index
    %49 = vector.load %arg3[%c0_14, %c0_15] : memref<8x128xf32, #tpu.memory_space<vmem>>, vector<8x128xf32>
    tpu.vector_store %arg3[%c0_14, %c0_15], %48 {strides = array<i32>} : memref<8x128xf32, #tpu.memory_space<vmem>>, vector<8x128xf32>,
    return
  }
  func.func @transform_0(%arg0: i32) -> (i32, i32) {
    %c0_i32 = arith.constant 0 : i32
    %c0_i32_0 = arith.constant 0 : i32
    return %arg0, %c0_i32 : i32, i32
  }
  func.func @transform_1(%arg0: i32) -> (i32, i32) {
    %c0_i32 = arith.constant 0 : i32
    %c0_i32_0 = arith.constant 0 : i32
    %c0_i32_1 = arith.constant 0 : i32
    return %c0_i32, %c0_i32_0 : i32, i32
  }
  func.func @transform_2(%arg0: i32) -> (i32, i32) {
    %c0_i32 = arith.constant 0 : i32
    %c0_i32_0 = arith.constant 0 : i32
    return %arg0, %c0_i32 : i32, i32
  }
}

</mosaic_0001>

<bundles_post_ra>
// kernel: tpu_custom_call.1
= control target key start
LH: loop header
LB: loop body
LE: loop exit
PB: predicated region body
PF: predicated region fallthrough
CT: control target
= control target key end

     0   :  { %7 = vsyncpa [#allocation3], 0  ;;  %s312_s0 = inlined_call_operand.hbm [shape: f32[4,128], index: 0, kind: input, shape index: {}]   ;;  %s313_s1 = inlined_call_operand.hbm [shape: f32[1,128], index: 1, kind: input, shape index: {}]   ;;  %s314_s2 = inlined_call_operand.hbm [shape: f32[4,128], index: 2, kind: output, shape index: {}]  }
   0x1   :  { %8 = vsyncpa [#allocation6], 0 }
   0x2   :  { %9 = vsyncpa [#allocation4], 0 }
   0x3   :  { %13 = vsyncadd [#allocation3], 64  ;;  %s14_s11 = sshll.u32 %s312_s0, 4  ;;  %s254_s12 = smov [#allocation2]   ;;  %s15_s11 = int_to_ptr.hbm [resolvable:$true] %s14_s11 }
   0x4   :  { %s16_s13 = sshll.u32 %s254_s12, 4  ;;  %s28_s16 = sshll.u32 %s313_s1, 4  ;;  %s17_s13 = int_to_ptr.vmem [resolvable:$true] %s16_s13  ;;  %s29_s16 = int_to_ptr.hbm [resolvable:$true] %s28_s16 }
   0x5   :  { %s255_s17 = smov 64   ;;  %s256_s18 = smov 4  }
   0x6   :  { %22 = dma.hbm_to_vmem [thread:$0]  %s15_s11, 64, %s17_s13, [#allocation3], %s255_s17, %s255_s17, %s256_s18  }
   0x7   :  { %s257_s19 = smov [#allocation5]  }
   0x8   :  { %s30_s20 = sshll.u32 %s257_s19, 4  ;;  %s31_s20 = int_to_ptr.vmem [resolvable:$true] %s30_s20 }
   0x9   :  { %33 = dma.hbm_to_vmem [thread:$0]  %s29_s16, 16, %s31_s20, [#allocation6]  }
   0xa   :  { %248 = dma.done.wait [#allocation3], 128  }
   0xb   :  { %249 = vsyncadd [#allocation3], 4294967168 }
   0xc   :  { %250 = dma.done.wait [#allocation6], 16  }
   0xd   :  { %251 = vsyncadd [#allocation6], 4294967280  ;;  %v286_v0 = vld [vmem:[#allocation2] sm:$0xff]  ;;  %s258_s0 = smov 32   ;;  %s259_s1 = smov 96   ;;  %vm44_vm0 = vcmask 261120  }
   0xe   :  { %v43_v1 = vmul.f32 %v286_v0, %v286_v0  ;;  %v260_v9 = vmov 32.0   ;;  %vm127_vm14 = vcmask 523264   ;;  %v165_v59 = vld [vmem:[#allocation5] ss:$0 sm:$0xff]  ;;  %vm129_vm15 = vcmask 785408  }
   0xf   :  { %166 = vrcp.f32 %v260_v9 }
  0x10   :  { %107 = vrot.lane.b32.xlu1 %v43_v1, %s258_s0  ;;  %69 = vrot.lane.b32.xlu0 %v43_v1, %s259_s1  ;;  %v45_v2 = vsel %vm44_vm0, %v43_v1, 0.0 }
  0x15   :  { %v167_v10 = vpop.eup %166 }
  0x16   :  { %v49_v11 = vmul.f32 32.0, %v167_v10  ;;  %vm53_vm1 = vweird.f32 %v167_v10 }
  0x18   :  { %88 = vrot.lane.b32.xlu0 %v43_v1, %s255_s17  ;;  %v50_v12 = vsub.f32 1.0, %v49_v11 }
  0x1a   :  { %v51_v13 = vmul.f32 %v167_v10, %v50_v12 }
  0x1c   :  { %v52_v14 = vadd.f32 %v167_v10, %v51_v13 }
  0x1e   :  { %v54_v15 = vsel %vm53_vm1, %v167_v10, %v52_v14 }
  0x3a   :  { %46 = vadd.xlane.f32.xlu1 %v45_v2 }
  0x82   :  { %v108_v3 = vpop.permute.xlu1 %107  ;;  %v70_v4 = vpop.permute.xlu0 %69 }
  0x83   :  { %v110_v5 = vsel %vm44_vm0, %v108_v3, 0.0  ;;  %v72_v6 = vsel %vm44_vm0, %v70_v4, 0.0 }
  0x84   :  { %111 = vadd.xlane.f32.xlu0 %v110_v5  ;;  %73 = vadd.xlane.f32.xlu2 %v72_v6 }
  0x8a   :  { %v89_v7 = vpop.permute.xlu0 %88 }
  0x8b   :  { %v91_v8 = vsel %vm44_vm0, %v89_v7, 0.0 }
  0x8c   :  { %92 = vadd.xlane.f32.xlu2 %v91_v8 }
  0xad   :  { %v47_v16 = vpop.xlane.xlu1 %46 }
  0xae   :  { %v55_v17 = vmul.f32 %v54_v15, %v47_v16 }
  0xb0   :  { %v56_v18 = vadd.f32 1e-06, %v55_v17 }
  0xb2   :  { %168 = vrsqrt.f32 %v56_v18  ;;  %vm63_vm2 = vweird.f32 %v56_v18 }
  0xb8   :  { %v169_v25 = vpop.eup %168 }
  0xb9   :  { %v58_v26 = vmul.f32 %v169_v25, %v56_v18  ;;  %vm64_vm3 = vweird.f32 %v169_v25 }
  0xba   :  { %vm295_vm5 = vmor %vm63_vm2, %vm64_vm3 }
  0xbb   :  { %v59_v30 = vmul.f32 %v169_v25, %v58_v26 }
  0xbd   :  { %v60_v36 = vmul.f32 0.5, %v59_v30 }
  0xbf   :  { %v61_v42 = vsub.f32 1.5, %v60_v36 }
  0xc1   :  { %v62_v47 = vmul.f32 %v169_v25, %v61_v42 }
  0xc3   :  { %v66_v53 = vsel %vm295_vm5, %v169_v25, %v62_v47 }
  0xc4   :  { %v67_v57 = vmul.f32 %v66_v53, %v286_v0 }
  0xf7   :  { %v74_v19 = vpop.xlane.xlu2 %73  ;;  %v112_v20 = vpop.xlane.xlu0 %111 }
  0xf8   :  { %v75_v21 = vmul.f32 %v74_v19, %v54_v15  ;;  %v113_v22 = vmul.f32 %v112_v20, %v54_v15 }
  0xfa   :  { %v76_v23 = vadd.f32 1e-06, %v75_v21  ;;  %v114_v24 = vadd.f32 1e-06, %v113_v22 }
  0xfc   :  { %170 = vrsqrt.f32 %v76_v23  ;;  %vm83_vm6 = vweird.f32 %v76_v23  ;;  %vm121_vm8 = vweird.f32 %v114_v24 }
  0xfd   :  { %172 = vrsqrt.f32 %v114_v24 }
  0xff   :  { %v93_v27 = vpop.xlane.xlu2 %92 }
 0x100   :  { %v94_v28 = vmul.f32 %v93_v27, %v54_v15 }
 0x102   :  { %v171_v29 = vpop.eup %170  ;;  %v95_v31 = vadd.f32 1e-06, %v94_v28 }
 0x103   :  { %v173_v32 = vpop.eup %172  ;;  %v78_v33 = vmul.f32 %v171_v29, %v76_v23  ;;  %vm84_vm4 = vweird.f32 %v171_v29 }
 0x104   :  { %v116_v34 = vmul.f32 %v173_v32, %v114_v24  ;;  %174 = vrsqrt.f32 %v95_v31  ;;  %vm85_vm7 = vmor %vm83_vm6, %vm84_vm4  ;;  %vm122_vm9 = vweird.f32 %v173_v32  ;;  %vm102_vm12 = vweird.f32 %v95_v31 }
 0x105   :  { %v79_v35 = vmul.f32 %v171_v29, %v78_v33  ;;  %vm123_vm11 = vmor %vm121_vm8, %vm122_vm9 }
 0x106   :  { %v117_v37 = vmul.f32 %v173_v32, %v116_v34 }
 0x107   :  { %v80_v38 = vmul.f32 0.5, %v79_v35 }
 0x108   :  { %v118_v39 = vmul.f32 0.5, %v117_v37 }
 0x109   :  { %v81_v40 = vsub.f32 1.5, %v80_v38 }
 0x10a   :  { %v175_v41 = vpop.eup %174  ;;  %v119_v45 = vsub.f32 1.5, %v118_v39 }
 0x10b   :  { %v97_v43 = vmul.f32 %v175_v41, %v95_v31  ;;  %v82_v44 = vmul.f32 %v171_v29, %v81_v40  ;;  %vm103_vm10 = vweird.f32 %v175_v41 }
 0x10c   :  { %v120_v51 = vmul.f32 %v173_v32, %v119_v45  ;;  %vm104_vm13 = vmor %vm102_vm12, %vm103_vm10 }
 0x10d   :  { %v98_v46 = vmul.f32 %v175_v41, %v97_v43  ;;  %v86_v50 = vsel %vm85_vm7, %v171_v29, %v82_v44 }
 0x10e   :  { %v87_v54 = vmul.f32 %v86_v50, %v286_v0  ;;  %v124_v56 = vsel %vm123_vm11, %v173_v32, %v120_v51 }
 0x10f   :  { %v99_v49 = vmul.f32 0.5, %v98_v46  ;;  %v125_v62 = vmul.f32 %v124_v56, %v286_v0 }
 0x110   :  { %v126_v61 = vsel %vm44_vm0, %v67_v57, %v87_v54 }
 0x111   :  { %v100_v52 = vsub.f32 1.5, %v99_v49 }
 0x113   :  { %v101_v55 = vmul.f32 %v175_v41, %v100_v52 }
 0x115   :  { %v105_v58 = vsel %vm104_vm13, %v175_v41, %v101_v55 }
 0x116   :  { %v106_v60 = vmul.f32 %v105_v58, %v286_v0 }
 0x118   :  { %v128_v63 = vsel %vm127_vm14, %v126_v61, %v106_v60 }
 0x119   :  { %v130_v1 = vsel %vm129_vm15, %v128_v63, %v125_v62 }
 0x11a   :  { %v135_v2 = vmul.f32 %v165_v59, %v130_v1 }
 0x11c   :  { %136 = vst [vmem:[#allocation7] sm:$0xff] %v135_v2 }
 0x11d   :  { %140 = vsyncadd [#allocation4], 64  ;;  %s143_s23 = sshll.u32 %s314_s2, 4  ;;  %s261_s24 = smov [#allocation7]   ;;  %s144_s23 = int_to_ptr.hbm [resolvable:$true] %s143_s23 }
 0x11e   :  { %s141_s25 = sshll.u32 %s261_s24, 4  ;;  %s142_s25 = int_to_ptr.vmem [resolvable:$true] %s141_s25 }
 0x11f   :  { %149 = dma.vmem_to_hbm [thread:$0]  %s142_s25, 64, %s144_s23, [#allocation4], %s255_s17, %s255_s17, %s256_s18  }
 0x120   :  { %252 = dma.done.wait [#allocation4], 128  }
 0x121   :  { %253 = vsyncadd [#allocation4], 4294967168 }
 0x122   :  { %154 = vsyncpa [#allocation3], 1 }
 0x123   :  { %155 = vsyncpa [#allocation6], 1 }
 0x124   :  { %156 = vsyncpa [#allocation4], 1 }

</bundles_post_ra>
